<compile_context>
chip_gen: v5e
topology: v5e:2x2
jax: 0.10.0
libtpu: 0.0.40
codegen_flags: <defaults>
</compile_context>

<pallas_src>
import numpy as np

import jax
import jax.numpy as jnp
from jax.experimental import pallas as pl
from jax.experimental.pallas import tpu as pltpu


def _decode_kernel(x_ref, mask_ref, scale_ref, off_ref, o_ref):
    """Decode one image slab.

    x_ref    : (1, R, GG)  raw logits, R = num_anchors * (5 + num_class)
    mask_ref : (R, 1)      1.0 on w/h rows (exp path), 0.0 elsewhere (sigmoid path)
    scale_ref: (R, 1)      per-row multiplicative constant
                           (stride for x/y, absolute anchor w/h, 1 for conf/cls)
    off_ref  : (R, GG)     per-row additive plane (grid-cell offset * stride on
                           x/y rows, 0 elsewhere)
    o_ref    : (1, R, GG)  decoded output (single unmasked full-tile store)
    """
    p = x_ref[0].astype(jnp.float32)                 # (R, GG), lane-dense
    wh = mask_ref[...] > 0.5                         # (R, 1) bool, broadcasts on lanes
    e = jnp.exp(jnp.where(wh, p, -p))                # single transcendental pass
    dec = jnp.where(wh, e, 1.0 / (1.0 + e))          # exp(p) or sigmoid(p)
    o_ref[0] = (dec * scale_ref[...] + off_ref[...]).astype(o_ref.dtype)


def make_yolo_output_and_loss(anchors, num_class, img_size):
    """Builds a forward(x, targets=None) mirroring the PyTorch module."""
    A = len(anchors)
    D = num_class + 5
    R = A * D
    anch_np = np.asarray(anchors, np.float32)        # (A, 2), absolute sizes

    def forward(x, targets=None):
        N, C, G, _ = x.shape
        assert C == R, f"expected {R} channels, got {C}"
        GG = G * G
        stride = float(img_size) / float(G)

        # --- compile-time row constants (numpy -> baked into the executable) ---
        ar = np.arange(G, dtype=np.float32)
        gx = np.tile(ar, G) * stride                 # (GG,) column j, pre-scaled
        gy = np.repeat(ar, G) * stride               # (GG,) row    i, pre-scaled
        d_idx = np.tile(np.arange(D), A)             # attribute index per row
        a_idx = np.repeat(np.arange(A), D)           # anchor index per row

        wh_mask = ((d_idx == 2) | (d_idx == 3)).astype(np.float32).reshape(R, 1)
        scale = np.ones(R, np.float32)
        scale[d_idx < 2] = stride                    # box center x, y
        scale[d_idx == 2] = anch_np[a_idx[d_idx == 2], 0]   # exp(t)*a_w (stride folded)
        scale[d_idx == 3] = anch_np[a_idx[d_idx == 3], 1]   # exp(t)*a_h
        scale = scale.reshape(R, 1)
        offset = np.zeros((R, GG), np.float32)
        offset[d_idx == 0, :] = gx
        offset[d_idx == 1, :] = gy

        xr = x.reshape(N, R, GG)                     # free NCHW reshape, native dtype

        elems = N * R * GG
        bytes_accessed = int(elems * (x.dtype.itemsize + 4) + (R * GG + 2 * R) * 4)
        out = pl.pallas_call(
            _decode_kernel,
            out_shape=jax.ShapeDtypeStruct((N, R, GG), jnp.float32),
            grid=(N,),
            in_specs=[
                pl.BlockSpec((1, R, GG), lambda n: (n, 0, 0)),
                pl.BlockSpec((R, 1), lambda n: (0, 0)),
                pl.BlockSpec((R, 1), lambda n: (0, 0)),
                pl.BlockSpec((R, GG), lambda n: (0, 0)),
            ],
            out_specs=pl.BlockSpec((1, R, GG), lambda n: (n, 0, 0)),
            compiler_params=pltpu.CompilerParams(
                dimension_semantics=("parallel",)),
            cost_estimate=pl.CostEstimate(
                flops=5 * elems,
                transcendentals=elems,
                bytes_accessed=bytes_accessed),
        )(xr,
          jnp.asarray(wh_mask),
          jnp.asarray(scale),
          jnp.asarray(offset))

        # (N, A*D, GG) -> (N, A, GG, D) -> (N, A*G*G, 5+C): same ordering as
        # prediction.permute(0, 1, 3, 4, 2).view(N, -1, D) in the reference.
        # (Downstream consumers that accept the lane-dense (N, A*D, GG) layout can
        # skip this single XLA relayout pass.)
        output = jnp.transpose(out.reshape(N, A, D, GG), (0, 1, 3, 2)).reshape(
            N, A * GG, D)

        if targets is None:
            return output, jnp.asarray(0.0, jnp.float32)
        # TODO(synk): build_targets() is not defined in the reference source, so the
        # MSE/BCE training-loss branch (targets is not None) cannot be reproduced.
        return output, jnp.asarray(0.0, jnp.float32)

    return forward


def _reference_decode(x, anchors, num_class, img_size):
    """Pure-JAX transcription of the PyTorch forward (targets=None path)."""
    N, _, G, _ = x.shape
    A = len(anchors)
    D = num_class + 5
    stride = img_size / G
    pred = x.reshape(N, A, D, G, G).transpose(0, 1, 3, 4, 2)      # (N,A,Gi,Gj,D)
    sx = jax.nn.sigmoid(pred[..., 0])
    sy = jax.nn.sigmoid(pred[..., 1])
    w = pred[..., 2]
    h = pred[..., 3]
    conf = jax.nn.sigmoid(pred[..., 4])
    cls = jax.nn.sigmoid(pred[..., 5:])
    gx = jnp.arange(G, dtype=jnp.float32).reshape(1, 1, 1, G)
    gy = jnp.arange(G, dtype=jnp.float32).reshape(1, 1, G, 1)
    sa = jnp.asarray(anchors, jnp.float32) / stride
    aw = sa[:, 0].reshape(1, A, 1, 1)
    ah = sa[:, 1].reshape(1, A, 1, 1)
    boxes = jnp.stack([sx + gx, sy + gy, jnp.exp(w) * aw, jnp.exp(h) * ah], -1)
    return jnp.concatenate(
        [boxes.reshape(N, -1, 4) * stride,
         conf.reshape(N, -1, 1),
         cls.reshape(N, -1, num_class)], axis=-1)


if __name__ == "__main__":
    num_class = 3
    img_size = 128
    anchors = [(116, 90), (156, 198), (373, 326)]
    batch = 2
    G = 16                          # detection grid -> stride = 8
    A = len(anchors)
    D = num_class + 5               # 8

    key = jax.random.PRNGKey(0)
    x = jax.random.normal(key, (batch, A * D, G, G), jnp.float32)

    model = make_yolo_output_and_loss(anchors, num_class, img_size)
    output, loss = jax.jit(model)(x)
    output = jax.block_until_ready(output)
    loss = jax.block_until_ready(loss)

    assert output.shape == (batch, A * G * G, D)
    assert bool(jnp.all(jnp.isfinite(output)))
    assert float(loss) == 0.0

    ref = _reference_decode(x, anchors, num_class, img_size)
    assert bool(jnp.allclose(output, ref, rtol=2e-4, atol=2e-4)), float(
        jnp.max(jnp.abs(output - ref)))
    print("KERNEL_OK")
</pallas_src>

<mosaic_0001>
module attributes {stable_mosaic.version = 11 : i64} {
  func.func @_decode_kernel(%arg0: i32, %arg1: memref<1x24x256xf32, #tpu.memory_space<vmem>>, %arg2: memref<24x1xf32, #tpu.memory_space<vmem>>, %arg3: memref<24x1xf32, #tpu.memory_space<vmem>>, %arg4: memref<24x256xf32, #tpu.memory_space<vmem>>, %arg5: memref<1x24x256xf32, #tpu.memory_space<vmem>>) attributes {dimension_semantics = [#tpu.dimension_semantics<parallel>], iteration_bounds = array<i64: 2>, scalar_prefetch = 0 : i64, scratch_operands = 0 : i64, tpu.core_type = #tpu.core_type<tc>, window_params = [{transform_indices = @transform_0, window_bounds = array<i64: 1, 24, 256>}, {pipeline_mode = #tpu.pipeline_mode<synchronous>, transform_indices = @transform_1, window_bounds = array<i64: 24, 1>}, {pipeline_mode = #tpu.pipeline_mode<synchronous>, transform_indices = @transform_2, window_bounds = array<i64: 24, 1>}, {pipeline_mode = #tpu.pipeline_mode<synchronous>, transform_indices = @transform_3, window_bounds = array<i64: 24, 256>}, {transform_indices = @transform_4, window_bounds = array<i64: 1, 24, 256>}]} {
    %c0 = arith.constant 0 : index
    %c0_0 = arith.constant 0 : index
    %c0_1 = arith.constant 0 : index
    %0 = vector.load %arg1[%c0, %c0_0, %c0_1] : memref<1x24x256xf32, #tpu.memory_space<vmem>>, vector<1x24x256xf32>
    %1 = vector.shape_cast %0 : vector<1x24x256xf32> to vector<24x256xf32>
    %c0_2 = arith.constant 0 : index
    %c0_3 = arith.constant 0 : index
    %2 = vector.load %arg2[%c0_2, %c0_3] : memref<24x1xf32, #tpu.memory_space<vmem>>, vector<24x1xf32>
    %cst = arith.constant 5.000000e-01 : f32
    %3 = vector.broadcast %cst : f32 to vector<24x1xf32>
    %4 = arith.cmpf ogt, %2, %3 : vector<24x1xf32>
    %cst_4 = arith.constant 0.000000e+00 : f32
    %5 = vector.broadcast %cst_4 : f32 to vector<24x256xf32>
    %6 = arith.subf %5, %1 : vector<24x256xf32>
    %7 = vector.shape_cast %4 : vector<24x1xi1> to vector<24x1xi1>
    %8 = vector.broadcast %7 : vector<24x1xi1> to vector<24x256xi1>
    %9 = arith.select %8, %1, %6 : vector<24x256xi1>, vector<24x256xf32>
    %10 = math.exp %9 : vector<24x256xf32>
    %cst_5 = arith.constant 1.000000e+00 : f32
    %11 = vector.broadcast %cst_5 : f32 to vector<24x256xf32>
    %12 = arith.addf %11, %10 : vector<24x256xf32>
    %cst_6 = arith.constant 1.000000e+00 : f32
    %13 = vector.broadcast %cst_6 : f32 to vector<24x256xf32>
    %14 = arith.divf %13, %12 : vector<24x256xf32>
    %15 = vector.shape_cast %4 : vector<24x1xi1> to vector<24x1xi1>
    %16 = vector.broadcast %15 : vector<24x1xi1> to vector<24x256xi1>
    %17 = arith.select %16, %10, %14 : vector<24x256xi1>, vector<24x256xf32>
    %c0_7 = arith.constant 0 : index
    %c0_8 = arith.constant 0 : index
    %18 = vector.load %arg3[%c0_7, %c0_8] : memref<24x1xf32, #tpu.memory_space<vmem>>, vector<24x1xf32>
    %19 = vector.broadcast %18 : vector<24x1xf32> to vector<24x256xf32>
    %20 = arith.mulf %17, %19 : vector<24x256xf32>
    %c0_9 = arith.constant 0 : index
    %c0_10 = arith.constant 0 : index
    %21 = vector.load %arg4[%c0_9, %c0_10] : memref<24x256xf32, #tpu.memory_space<vmem>>, vector<24x256xf32>
    %22 = arith.addf %20, %21 : vector<24x256xf32>
    %c0_11 = arith.constant 0 : index
    %c0_12 = arith.constant 0 : index
    %c0_13 = arith.constant 0 : index
    %23 = vector.load %arg5[%c0_11, %c0_12, %c0_13] : memref<1x24x256xf32, #tpu.memory_space<vmem>>, vector<1x24x256xf32>
    %24 = vector.shape_cast %23 : vector<1x24x256xf32> to vector<24x256xf32>
    %25 = vector.shape_cast %22 : vector<24x256xf32> to vector<1x24x256xf32>
    tpu.vector_store %arg5[%c0_11, %c0_12, %c0_13], %25 {strides = array<i32>} : memref<1x24x256xf32, #tpu.memory_space<vmem>>, vector<1x24x256xf32>,
    return
  }
  func.func @transform_0(%arg0: i32) -> (i32, i32, i32) {
    %c0_i32 = arith.constant 0 : i32
    %c0_i32_0 = arith.constant 0 : i32
    %c0_i32_1 = arith.constant 0 : i32
    return %arg0, %c0_i32, %c0_i32_0 : i32, i32, i32
  }
  func.func @transform_1(%arg0: i32) -> (i32, i32) {
    %c0_i32 = arith.constant 0 : i32
    %c0_i32_0 = arith.constant 0 : i32
    %c0_i32_1 = arith.constant 0 : i32
    return %c0_i32, %c0_i32_0 : i32, i32
  }
  func.func @transform_2(%arg0: i32) -> (i32, i32) {
    %c0_i32 = arith.constant 0 : i32
    %c0_i32_0 = arith.constant 0 : i32
    %c0_i32_1 = arith.constant 0 : i32
    return %c0_i32, %c0_i32_0 : i32, i32
  }
  func.func @transform_3(%arg0: i32) -> (i32, i32) {
    %c0_i32 = arith.constant 0 : i32
    %c0_i32_0 = arith.constant 0 : i32
    %c0_i32_1 = arith.constant 0 : i32
    return %c0_i32, %c0_i32_0 : i32, i32
  }
  func.func @transform_4(%arg0: i32) -> (i32, i32, i32) {
    %c0_i32 = arith.constant 0 : i32
    %c0_i32_0 = arith.constant 0 : i32
    %c0_i32_1 = arith.constant 0 : i32
    return %arg0, %c0_i32, %c0_i32_0 : i32, i32, i32
  }
}

</mosaic_0001>

<bundles_post_ra>
// kernel: forward.1
= control target key start
LH: loop header
LB: loop body
LE: loop exit
PB: predicated region body
PF: predicated region fallthrough
CT: control target
= control target key end

     0   :  { %9 = vsyncpa [#allocation3], 0  ;;  %s936_s0 = inlined_call_operand.vmem [shape: f32[2,24,256], index: 0, kind: input, shape index: {}]   ;;  %s937_s1 = inlined_call_operand.vmem [shape: f32[24,1], index: 1, kind: input, shape index: {}]   ;;  %s938_s2 = inlined_call_operand.vmem [shape: f32[24,1], index: 2, kind: input, shape index: {}]   ;;  %s939_s3 = inlined_call_operand.vmem [shape: f32[24,256], index: 3, kind: input, shape index: {}]   ;;  %s940_s4 = inlined_call_operand.hbm [shape: f32[2,24,256], index: 4, kind: output, shape index: {}]  }
   0x1   :  { %11 = vsyncpa [#allocation3 + $0x1], 0  ;;  %s641_s15 = smov 0   ;;  %s643_s16 = smov 0  }
   0x2   :  { %s645_s17 = smov 0   ;;  %s647_s18 = smov 0  }
   0x3 LB: > { %s662_s19 = sadd.s32 4294967295, %s611_s18   ;;  %s469_s20 = sadd.s32 4294967294, %s611_s18   ;;  %s611_s18 = sphi %s647_s18, %s969_s18   ;;  %s607_s17 = sphi %s645_s17, %s968_s17   ;;  %s603_s16 = sphi %s643_s16, %s967_s16   ;;  %s599_s15 = sphi %s641_s15, %s966_s15  }
   0x4   : > { %s666_s21 = sadd.s32 1, %s611_s18   ;;  %s113_s22 = sadd.s32 1, %s607_s17 }
   0x5   : > { %s110_s23 = ssub.s32 %s611_s18, %s666_s21  ;;  %p123_p0 = scmp.ne.s32.totalorder %s607_s17, %s603_s16 }
   0x6   : > { %p111_p1 = scmp.eq.s32.totalorder %s110_s23, 0  ;;  %p124_p2 = scmp.eq.s32.totalorder %s662_s19, 1 }
   0x7   : > { %p129_p3 = scmp.ne.s32.totalorder %s603_s16, %s599_s15  ;;  %p130_p4 = scmp.eq.s32.totalorder %s469_s20, 1 }
   0x8   : > { %s677_s24 = scalar_select %p111_p1, %s607_s17, %s113_s22  }
   0x9   : > { %p679_p5 = por %p124_p2, %p123_p0  ;;  %p683_p6 = por %p130_p4, %p129_p3 }
   0xa   : > { %p472_p7 = scmp.ge.s32.totalorder %s611_s18, 1  ;;  %p165_p8 = scmp.lt.s32.totalorder %s611_s18, 3 }
   0xc   : > { %p166_p9 = pnand %p472_p7, %p165_p8 }
   0xd   : > { %p191_p10 = scmp.lt.s32.totalorder (!%p166_p9), %s662_s19, 1  ;;  %s188_s27 = sand.u32 (!%p166_p9), 1, %s603_s16  }
   0xe   : > { %169 = sbr.rel (%p166_p9) target bundleno = 189 (0xbd), region = 36  ;;  %s392_s5 = scalar_lea.sflag (!%p166_p9), [#allocation3], %s188_s27 }
   0xf   : > { %s827_s28 = smul.u32 (!%p166_p9), 48, %s188_s27  ;;  %s569_s10 = scalar_lea.hbm (!%p166_p9), %s940_s4, 96 }
  0x10   : > { %s479_s11 = smul.u32 (!%p166_p9), 48, %s662_s19 }
  0x11   : > { %s878_s12 = scalar_lea.vmem (!%p166_p9), [#allocation2], %s827_s28 }
  0x12   : > { %s403_s22 = scalar_lea.hbm (!%p166_p9), %s940_s4, %s479_s11 }
  0x13   : > { %v204_v0 = vld [vmem:[%s937_s1 + $0x10] sm:$0xff]  ;;  %v202_v1 = vld [vmem:[%s937_s1] sm:$0xff]  ;;  %v613_v2 = vmov 0   ;;  %v350_v3 = vld [vmem:[%s938_s2 + $0x8] sm:$0xff]  ;;  %s192_s13 = scalar_select %p191_p10, %s662_s19, 1 }
  0x14   : > { %523 = vset.pattern.permute.xlu1 %v613_v2  ;;  %522 = vset.pattern.permute.xlu0 %v613_v2  ;;  %vm207_vm0 = vcmp.gt.f32.partialorder %v204_v0, 0.5  ;;  %vm205_vm1 = vcmp.gt.f32.partialorder %v202_v1, 0.5  ;;  %v203_v6 = vld [vmem:[%s937_s1 + $0x8] sm:$0xff]  ;;  %v349_v7 = vld [vmem:[%s938_s2] sm:$0xff]  ;;  %v351_v9 = vld [vmem:[%s938_s2 + $0x10] sm:$0xff]  ;;  %s406_s30 = sshll.u32 %s403_s22, 4  ;;  %s407_s30 = int_to_ptr.hbm [resolvable:$true] %s406_s30 }
  0x15   : > { %v216_v4 = vsel %vm207_vm0, 1, %v613_v2  ;;  %v214_v5 = vsel %vm205_vm1, 1, %v613_v2  ;;  %524 = vset.pattern.permute.xlu2 %v613_v2  ;;  %vm206_vm2 = vcmp.gt.f32.partialorder %v203_v6, 0.5  ;;  %s478_s14 = smul.u32 48, %s192_s13  ;;  %s563_s6 = sshra.s32 %s407_s30, 4  ;;  %s564_s6 = int_to_ptr.hbm [resolvable:$true] %s563_s6 }
  0x16   : > { %224 = vperm.xlu1 %523, %v216_v4   ;;  %218 = vperm.xlu0 %522, %v214_v5   ;;  %v215_v8 = vsel %vm206_vm2, 1, %v613_v2  ;;  %s565_s7 = scalar_lea.hbm %s564_s6, 48  ;;  %p570_p0 = scmp.lt.s32.totalorder %s564_s6, %s940_s4 }
  0x17   : > { %359 = vperm.xlu2 %524, %v350_v3   ;;  %s195_s23 = scalar_lea.vmem %s936_s0, %s478_s14  ;;  %p566_p11 = scmp.ne.s32.totalorder %s564_s6, %s565_s7 }
  0x18   : > { %v200_v10 = vld [vmem:[%s195_s23 + $0x20] sm:$0xff]  ;;  %v201_v11 = vld [vmem:[%s195_s23 + $0x28] sm:$0xff]  ;;  %v198_v24 = vld [vmem:[%s195_s23 + $0x10] sm:$0xff]  ;;  %p571_p1 = scmp.lt.s32.totalorder %s569_s10, %s565_s7 }
  0x19   : > { %v196_v12 = vld [vmem:[%s195_s23] sm:$0xff]  ;;  %v197_v13 = vld [vmem:[%s195_s23 + $0x8] sm:$0xff]  ;;  %v212_v14 = vsub.f32 0.0, %v200_v10  ;;  %v213_v15 = vsub.f32 0.0, %v201_v11  ;;  %v199_v29 = vld [vmem:[%s195_s23 + $0x18] sm:$0xff]  ;;  %v210_v30 = vsub.f32 0.0, %v198_v24  ;;  %p567_p12 = pnand %p566_p11, %p679_p5 }
  0x1a   : > { %v208_v16 = vsub.f32 0.0, %v196_v12  ;;  %v209_v17 = vsub.f32 0.0, %v197_v13  ;;  %v211_v31 = vsub.f32 0.0, %v199_v29  ;;  %s404_s23 = sshll.u32 %s878_s12, 4  ;;  %p572_p2 = por %p571_p1, %p570_p0  ;;  %s405_s23 = int_to_ptr.vmem [resolvable:$true] %s404_s23 }
  0x1b   : > { %p568_p13 = pneg %p567_p12 }
  0x1d   : > { %p573_p3 = pnand %p572_p2, %p568_p13 }
  0x1e   : > { %354 = vperm.xlu1 %523, %v349_v7   ;;  %221 = vperm.xlu0 %522, %v215_v8  }
  0x1f   : > { %364 = vperm.xlu2 %524, %v351_v9  }
  0x71   : > { %v760_v58 = vpop.permute.xlu2 %359 }
  0x88   : > { %v712_v18 = vpop.permute.xlu1 %224  ;;  %v714_v19 = vpop.permute.xlu0 %218 }
  0x89   : > { %vm228_vm3 = vcmp.eq.s32.totalorder %v712_v18, 1  ;;  %vm942_vm4 = vcmp.eq.s32.totalorder %v714_v19, 1 }
  0x8a   : > { %v233_v20 = vsel %vm228_vm3, %v200_v10, %v212_v14  ;;  %v234_v21 = vsel %vm228_vm3, %v201_v11, %v213_v15  ;;  %v229_v22 = vsel %vm942_vm4, %v196_v12, %v208_v16  ;;  %v230_v23 = vsel %vm942_vm4, %v197_v13, %v209_v17 }
  0x8b   : > { %v243_v25 = vmul.f32 1.442695, %v233_v20  ;;  %v245_v26 = vmul.f32 1.442695, %v234_v21  ;;  %v235_v27 = vmul.f32 1.442695, %v229_v22 }
  0x8c   : > { %v237_v28 = vmul.f32 1.442695, %v230_v23 }
  0x8d   : > { %525 = vpow2.f32 %v243_v25 }
  0x8e   : > { %527 = vpow2.f32 %v245_v26 }
  0x8f   : > { %529 = vpow2.f32 %v235_v27 }
  0x90   : > { %531 = vpow2.f32 %v237_v28  ;;  %v726_v32 = vpop.permute.xlu0 %221 }
  0x91   : > { %vm941_vm5 = vcmp.eq.s32.totalorder %v726_v32, 1 }
  0x92   : > { %v231_v33 = vsel %vm941_vm5, %v198_v24, %v210_v30  ;;  %v232_v35 = vsel %vm941_vm5, %v199_v29, %v211_v31 }
  0x93   : > { %v731_v34 = vpop.eup %525  ;;  %v239_v36 = vmul.f32 1.442695, %v231_v33  ;;  %v241_v43 = vmul.f32 1.442695, %v232_v35 }
  0x94   : > { %v735_v37 = vpop.eup %527  ;;  %v251_v38 = vadd.f32 1.0, %v731_v34 }
  0x95   : > { %v738_v39 = vpop.eup %529  ;;  %v741_v40 = vadd.f32 1.0, %v735_v37  ;;  %533 = vpow2.f32 %v239_v36 }
  0x96   : > { %v743_v41 = vpop.eup %531  ;;  %535 = vrcp.f32 %v251_v38  ;;  %v247_v42 = vadd.f32 1.0, %v738_v39  ;;  %v322_v46 = vand.u32 2147483647, %v251_v38  ;;  %vm318_vm6 = vweird.f32 %v251_v38 }
  0x97   : > { %537 = vrcp.f32 %v741_v40  ;;  %v248_v44 = vadd.f32 1.0, %v743_v41  ;;  %v324_v53 = vand.u32 2147483648, %v251_v38  ;;  %vm333_vm9 = vweird.f32 %v741_v40 }
  0x98   : > { %539 = vrcp.f32 %v247_v42  ;;  %v264_v45 = vand.u32 2147483648, %v247_v42  ;;  %v262_v48 = vand.u32 2147483647, %v247_v42  ;;  %vm258_vm7 = vweird.f32 %v247_v42 }
  0x99   : > { %541 = vrcp.f32 %v248_v44  ;;  %v279_v49 = vand.u32 2147483648, %v248_v44  ;;  %v277_v51 = vand.u32 2147483647, %v248_v44  ;;  %vm273_vm8 = vweird.f32 %v248_v44 }
  0x9a   : > { %543 = vpow2.f32 %v241_v43  ;;  %v265_v57 = vor.u32 1.1754944e-38, %v264_v45  ;;  %vm762_vm10 = vcmp.eq.f32.partialorder %v322_v46, 8.507059e+37  ;;  %v337_v60 = vand.u32 2147483647, %v741_v40 }
  0x9b   : > { %v748_v47 = vpop.eup %533  ;;  %vm767_vm11 = vcmp.eq.f32.partialorder %v262_v48, 8.507059e+37  ;;  %v280_v0 = vor.u32 1.1754944e-38, %v279_v49  ;;  %vm775_vm12 = vcmp.eq.f32.partialorder %v277_v51, 8.507059e+37  ;;  %v325_v7 = vor.u32 1.1754944e-38, %v324_v53  ;;  %v373_v49 = vld [vmem:[%s939_s3] sm:$0xff] }
  0x9c   : > { %v750_v50 = vpop.eup %535  ;;  %v753_v52 = vadd.f32 1.0, %v748_v47  ;;  %vm785_vm15 = vcmp.eq.f32.partialorder %v337_v60, 8.507059e+37  ;;  %v339_v14 = vand.u32 2147483648, %v741_v40 }
  0x9d   : > { %v755_v54 = vpop.eup %537  ;;  %v314_v55 = vmul.f32 %v750_v50, %v251_v38  ;;  %vm319_vm13 = vweird.f32 %v750_v50 }
  0x9e   : > { %v540_v56 = vpop.eup %539  ;;  %545 = vrcp.f32 %v753_v52  ;;  %v329_v2 = vmul.f32 %v755_v54, %v741_v40  ;;  %v292_v6 = vand.u32 2147483647, %v753_v52  ;;  %vm797_vm2 = vmor %vm318_vm6, %vm319_vm13  ;;  %vm334_vm5 = vweird.f32 %v755_v54  ;;  %v355_v40 = vpop.permute.xlu1 %354 }
  0x9f   : > { %v542_v61 = vpop.eup %541  ;;  %v254_v62 = vmul.f32 %v540_v56, %v247_v42  ;;  %v315_v1 = vsub.f32 1.0, %v314_v55  ;;  %vm259_vm14 = vweird.f32 %v540_v56  ;;  %v294_v27 = vand.u32 2147483648, %v753_v52 }
  0xa0   : > { %v773_v3 = vpop.eup %543  ;;  %v269_v4 = vmul.f32 %v542_v61, %v248_v44  ;;  %v330_v11 = vsub.f32 1.0, %v329_v2  ;;  %vm274_vm0 = vweird.f32 %v542_v61  ;;  %vm805_vm1 = vmor %vm258_vm7, %vm259_vm14  ;;  %vm810_vm4 = vcmp.eq.f32.partialorder %v292_v6, 8.507059e+37  ;;  %v365_v44 = vpop.permute.xlu2 %364 }
  0xa1   : > { %v255_v8 = vsub.f32 1.0, %v254_v62  ;;  %v782_v9 = vadd.f32 1.0, %v773_v3  ;;  %v316_v10 = vmul.f32 %v750_v50, %v315_v1  ;;  %vm817_vm6 = vmor %vm273_vm8, %vm274_vm0  ;;  %v340_v33 = vor.u32 1.1754944e-38, %v339_v14  ;;  %v378_v62 = vld [vmem:[%s939_s3 + $0x28] sm:$0xff] }
  0xa2   : > { %v270_v12 = vsub.f32 1.0, %v269_v4  ;;  %v331_v22 = vmul.f32 %v755_v54, %v330_v11  ;;  %vm335_vm8 = vmor %vm333_vm9, %vm334_vm5  ;;  %vm961_vm5 = vcmp.eq.s32.totalorder %v714_v19, 1 }
  0xa3   : > { %v256_v15 = vmul.f32 %v540_v56, %v255_v8  ;;  %547 = vrcp.f32 %v782_v9  ;;  %v317_v20 = vadd.f32 %v750_v50, %v316_v10  ;;  %vm962_vm9 = vmmov %vm961_vm5  ;;  %v307_v1 = vand.u32 2147483647, %v782_v9  ;;  %v375_v8 = vld [vmem:[%s939_s3 + $0x10] sm:$0xff] }
  0xa4   : > { %v546_v16 = vpop.eup %545  ;;  %v271_v17 = vmul.f32 %v542_v61, %v270_v12  ;;  %v332_v31 = vadd.f32 %v755_v54, %v331_v22  ;;  %v309_v6 = vand.u32 2147483648, %v782_v9  ;;  %vm303_vm13 = vweird.f32 %v782_v9 }
  0xa5   : > { %v257_v23 = vadd.f32 %v540_v56, %v256_v15  ;;  %v284_v25 = vmul.f32 %v546_v16, %v753_v52  ;;  %v321_v30 = vsel %vm797_vm2, %v750_v50, %v317_v20  ;;  %vm289_vm7 = vweird.f32 %v546_v16 }
  0xa6   : > { %v272_v28 = vadd.f32 %v542_v61, %v271_v17  ;;  %v326_v38 = vsel %vm762_vm10, %v325_v7, %v321_v30  ;;  %v336_v45 = vsel %vm335_vm8, %v755_v54, %v332_v31  ;;  %vm963_vm10 = vweird.f32 %v753_v52 }
  0xa7   : > { %v261_v35 = vsel %vm805_vm1, %v540_v56, %v257_v23  ;;  %v285_v36 = vsub.f32 1.0, %v284_v25  ;;  %v347_v46 = vsel %vm228_vm3, %v731_v34, %v326_v38  ;;  %v341_v54 = vsel %vm785_vm15, %v340_v33, %v336_v45  ;;  %v374_v34 = vld [vmem:[%s939_s3 + $0x8] sm:$0xff] }
  0xa8   : > { %v266_v42 = vsel %vm767_vm11, %v265_v57, %v261_v35  ;;  %v276_v43 = vsel %vm817_vm6, %v542_v61, %v272_v28  ;;  %v295_v57 = vor.u32 1.1754944e-38, %v294_v27  ;;  %v348_v19 = vsel %vm228_vm3, %v735_v37, %v341_v54  ;;  %vm290_vm11 = vmor %vm963_vm10, %vm289_vm7 }
  0xa9   : > { %v548_v48 = vpop.eup %547  ;;  %v281_v50 = vsel %vm775_vm12, %v280_v0, %v276_v43  ;;  %v343_v51 = vsel %vm961_vm5, %v738_v39, %v266_v42  ;;  %v286_v53 = vmul.f32 %v546_v16, %v285_v36  ;;  %v377_v39 = vld [vmem:[%s939_s3 + $0x20] sm:$0xff]  ;;  %v372_v2 = vmul.f32 %v365_v44, %v348_v19 }
  0xaa   : > { %v344_v55 = vsel %vm962_vm9, %v743_v41, %v281_v50  ;;  %v367_v56 = vmul.f32 %v355_v40, %v343_v51  ;;  %v299_v59 = vmul.f32 %v548_v48, %v782_v9  ;;  %v371_v41 = vmul.f32 %v365_v44, %v347_v46  ;;  %v376_v9 = vld [vmem:[%s939_s3 + $0x18] sm:$0xff] }
  0xab   : > { %v368_v60 = vmul.f32 %v355_v40, %v344_v55  ;;  %v287_v61 = vadd.f32 %v546_v16, %v286_v53  ;;  %vm304_vm3 = vweird.f32 %v548_v48  ;;  %v384_v52 = vadd.f32 %v378_v62, %v372_v2 }
  0xac   : > { %v379_v63 = vadd.f32 %v373_v49, %v367_v56  ;;  %v300_v0 = vsub.f32 1.0, %v299_v59  ;;  %v383_v7 = vadd.f32 %v377_v39, %v371_v41  ;;  %vm964_vm12 = vcmp.eq.s32.totalorder %v726_v32, 1 }
  0xad   : > { %v380_v4 = vadd.f32 %v374_v34, %v368_v60  ;;  %v291_v5 = vsel %vm290_vm11, %v546_v16, %v287_v61  ;;  %v310_v13 = vor.u32 1.1754944e-38, %v309_v6  ;;  %390 = vst [vmem:[%s878_s12 + $0x28] sm:$0xff] %v384_v52  ;;  %vm308_vm14 = vcmp.eq.f32.partialorder %v307_v1, 8.507059e+37  ;;  %vm965_vm15 = vmmov %vm964_vm12 }
  0xae   : > { %385 = vst [vmem:[%s878_s12] sm:$0xff] %v379_v63  ;;  %v296_v18 = vsel %vm810_vm4, %v295_v57, %v291_v5  ;;  %v301_v37 = vmul.f32 %v548_v48, %v300_v0  ;;  %vm305_vm4 = vmor %vm303_vm13, %vm304_vm3 }
  0xaf   : > { %386 = vst [vmem:[%s878_s12 + $0x8] sm:$0xff] %v380_v4  ;;  %v345_v10 = vsel %vm964_vm12, %v748_v47, %v296_v18 }
  0xb0   : > { %v302_v11 = vadd.f32 %v548_v48, %v301_v37  ;;  %v369_v12 = vmul.f32 %v760_v58, %v345_v10  ;;  %389 = vst [vmem:[%s878_s12 + $0x20] sm:$0xff] %v383_v7 }
  0xb2   : > { %v306_v14 = vsel %vm305_vm4, %v548_v48, %v302_v11  ;;  %v381_v15 = vadd.f32 %v375_v8, %v369_v12 }
  0xb3   : > { %v311_v47 = vsel %vm308_vm14, %v310_v13, %v306_v14 }
  0xb4   : > { %v346_v16 = vsel %vm965_vm15, %v773_v3, %v311_v47  ;;  %387 = vst [vmem:[%s878_s12 + $0x10] sm:$0xff] %v381_v15 }
  0xb5   : > { %v370_v17 = vmul.f32 %v760_v58, %v346_v16 }
  0xb7   : > { %v382_v20 = vadd.f32 %v376_v9, %v370_v17 }
  0xb9   : > { %388 = vst [vmem:[%s878_s12 + $0x18] sm:$0xff] %v382_v20 }
  0xba   : > { %576 = shalt.err (!%p573_p3)
}
  0xbb   : > { %s614_s27 = smov 256   ;;  %s615_s12 = smov 16  }
  0xbc   : > { %480 = dma.vmem_to_hbm [thread:$0]  (%p679_p5), %s405_s23, 768, %s407_s30, %s392_s5, %s614_s27, %s614_s27, %s615_s12  }
  0xbd PF: > { %p486_p4 = scmp.ge.s32.totalorder %s611_s18, 2  ;;  %s421_s14 = sand.u32 1, %s599_s15  }
  0xbe   : > { %s422_s19 = scalar_lea.sflag [#allocation3], %s421_s14 }
  0xbf   : > { %p483_p7 = pnand %p486_p4, %p683_p6 }
  0xc1   : > { %p484_p8 = pneg %p483_p7 }
  0xc3   : > { %594 = dma.done.wait (%p484_p8), %s422_s19, 768  }
  0xc4   : > { %596 = vsyncadd (%p484_p8), %s422_s19, 4294966528  ;;  %p14_p9 = scmp.ge.s32.totalorder %s666_s21, 4   ;;  %s966_s15 = smov %s603_s16 }
  0xc5   : > { %s967_s16 = smov %s607_s17  ;;  %s968_s17 = smov %s677_s24 }
  0xc6   : > { %s969_s18 = smov %s666_s21  ;;  %16 = sbr.rel (!%p14_p9) target bundleno = 3 (0x3), region = 71 }
  0xcb   :  { %428 = vsyncpa [#allocation3], 1 }
  0xcc   :  { %430 = vsyncpa [#allocation3 + $0x1], 1 }

</bundles_post_ra>
